<compile_context>
chip_gen: v6e
topology: v6e:2x2x1
jax: 0.10.0
libtpu: 0.0.40
codegen_flags: <defaults>
</compile_context>

<pallas_src>
import math
import numpy as np
import jax
import jax.numpy as jnp
from jax import lax
from jax.experimental import pallas as pl
from jax.experimental.pallas import tpu as pltpu  # noqa: F401  (TPU backend)

N_EMBD = 32
N_HEAD = 4
HEAD_DIM = N_EMBD // N_HEAD
EPS = 1e-6


# ----------------------------------------------------------------------------
# Kernel: one grid step over the whole flattened (B*T, C) activation slab.
# ----------------------------------------------------------------------------
def _block_kernel(x_ref, rot_ref, mask_ref, wqkv_ref, wo_ref, wfc_ref,
                  wproj_ref, o_ref):
    C = N_EMBD
    nh, hd = N_HEAD, HEAD_DIM

    x = x_ref[...].astype(jnp.float32)                       # (BT, C) residual

    # ---- RMSNorm (attention); gamma is folded into wqkv host-side ----
    ms = jnp.mean(x * x, axis=-1, keepdims=True)
    hin = (x * lax.rsqrt(ms + EPS)).astype(jnp.bfloat16)

    # ---- fused Q/K/V projection (single MXU matmul, f32 accumulation) ----
    qkv = jnp.dot(hin, wqkv_ref[...], preferred_element_type=jnp.float32)

    # ---- rotary: pair-swap already folded into the Q/K weight columns, so the
    #      rotary reduces to a single elementwise multiply by the precomputed
    #      (BT, C) multiplier (rot[2i] = -cos_half[i], rot[2i+1] = sin_half[i]).
    #      The softmax scale is applied once here to Q (fewer ops than scaling
    #      every per-head score tile).
    rot = rot_ref[...]
    scale = 1.0 / math.sqrt(hd)
    q = (rot * qkv[:, :C] * scale).astype(jnp.bfloat16)
    k = (rot * qkv[:, C:2 * C]).astype(jnp.bfloat16)
    v = qkv[:, 2 * C:].astype(jnp.bfloat16)

    # ---- causal attention: block-diagonal additive mask handles both the
    #      causal structure and the batch separation of the flattened rows.
    mask = mask_ref[...]                                     # (BT, BT) f32
    wo = wo_ref[...]                                         # (C, C) bf16

    att = None
    for h in range(nh):                                      # static unroll (4)
        lo, hi = h * hd, (h + 1) * hd
        qh, kh, vh = q[:, lo:hi], k[:, lo:hi], v[:, lo:hi]
        s = lax.dot_general(qh, kh, (((1,), (1,)), ((), ())),
                            preferred_element_type=jnp.float32) + mask
        s = s - jnp.max(s, axis=-1, keepdims=True)
        p = jnp.exp(s)
        p = p * pl.reciprocal(jnp.sum(p, axis=-1, keepdims=True), approx=True)
        yh = jnp.dot(p.astype(jnp.bfloat16), vh,
                     preferred_element_type=jnp.float32)
        # accumulate the output projection per head (no concatenate needed)
        contrib = jnp.dot(yh.astype(jnp.bfloat16), wo[lo:hi, :],
                          preferred_element_type=jnp.float32)
        att = contrib if att is None else att + contrib
    x1 = x + att

    # ---- RMSNorm (mlp); gamma is folded into wfc host-side ----
    ms2 = jnp.mean(x1 * x1, axis=-1, keepdims=True)
    hin2 = (x1 * lax.rsqrt(ms2 + EPS)).astype(jnp.bfloat16)

    # ---- gated MLP: c_fc -> chunk -> u * silu(v) -> mlp_c_proj ----
    uv = jnp.dot(hin2, wfc_ref[...], preferred_element_type=jnp.float32)
    u = uv[:, :4 * C]
    vg = uv[:, 4 * C:]
    xm = (u * (vg * jax.nn.sigmoid(vg))).astype(jnp.bfloat16)
    delta_mlp = jnp.dot(xm, wproj_ref[...], preferred_element_type=jnp.float32)

    o_ref[...] = (x1 + delta_mlp).astype(o_ref.dtype)


# ----------------------------------------------------------------------------
# Wrapper
# ----------------------------------------------------------------------------
def block_forward(x, rot, mask, wqkv_t, wo_t, wfc_t, wproj_t):
    B, T, C = x.shape
    BT = B * T
    xf = x.reshape(BT, C)

    def full(shape):
        return pl.BlockSpec(shape, lambda i: (0,) * len(shape))

    out = pl.pallas_call(
        _block_kernel,
        out_shape=jax.ShapeDtypeStruct((BT, C), x.dtype),
        grid=(1,),                                   # single step: no grid-loop overhead
        in_specs=[
            full((BT, C)),                           # x (flattened batch)
            full((BT, C)),                           # rotary multiplier
            full((BT, BT)),                          # additive block-diag causal mask
            full((C, 3 * C)),                        # fused [Wq|Wk|Wv]^T (perm + gamma folded)
            full((C, C)),                            # Wo^T
            full((C, 8 * C)),                        # Wfc^T (gamma folded)
            full((4 * C, C)),                        # Wproj^T
        ],
        out_specs=full((BT, C)),
    )(xf, rot, mask, wqkv_t, wo_t, wfc_t, wproj_t)
    return out.reshape(B, T, C)


# ----------------------------------------------------------------------------
# Host-side constant builders / parameter preparation
# ----------------------------------------------------------------------------
def make_rot_mult(B, T, head_dim, n_head):
    """(B*T, C) rotary multiplier implied by the reference rotary code."""
    pos = np.arange(T, dtype=np.float32)[:, None]
    div = np.exp(np.arange(0, head_dim, 2, dtype=np.float32)
                 * (-math.log(10000.0) / head_dim))
    emb = np.zeros((T, head_dim), np.float32)
    emb[:, 0::2] = np.sin(pos * div)
    emb[:, 1::2] = np.cos(pos * div)
    # reference casts sinusoidal_pos to q.dtype (bf16) before chunking
    emb = np.asarray(jnp.asarray(emb).astype(jnp.bfloat16).astype(jnp.float32))
    sin_half = emb[:, :head_dim // 2]     # chunk(2, -1)[0]
    cos_half = emb[:, head_dim // 2:]     # chunk(2, -1)[1]
    mult = np.zeros((T, head_dim), np.float32)
    mult[:, 0::2] = -cos_half
    mult[:, 1::2] = sin_half
    mult = np.tile(mult, (B, n_head))     # (B*T, C)
    return jnp.asarray(mult, dtype=jnp.float32)


def make_causal_mask(B, T):
    """Additive f32 (B*T, B*T) mask: 0 where same batch & causal, -1e30 else."""
    t = np.arange(T)
    causal = (t[None, :] <= t[:, None]).astype(np.float32)
    block = np.kron(np.eye(B, dtype=np.float32), causal)
    return jnp.asarray(np.where(block > 0, 0.0, -1e30).astype(np.float32))


def init_params(key, C):
    """Raw PyTorch-style (out, in) bf16 weights + RMSNorm gammas."""
    ks = jax.random.split(key, 6)

    def linear(k, fan_in, fan_out):
        bound = 1.0 / math.sqrt(fan_in)
        w = jax.random.uniform(k, (fan_out, fan_in), jnp.float32, -bound, bound)
        return w.astype(jnp.bfloat16)

    wq = linear(ks[0], C, C)
    wk = linear(ks[1], C, C)
    wv = linear(ks[2], C, C)
    wo = linear(ks[3], C, C)
    wfc = linear(ks[4], C, 8 * C)         # (8C, C)
    wproj = linear(ks[5], 4 * C, C)       # (C, 4C)
    gatt = jnp.ones((C,), jnp.bfloat16)
    gmlp = jnp.ones((C,), jnp.bfloat16)
    return wq, wk, wv, wo, wfc, wproj, gatt, gmlp


def prepare_kernel_params(wq, wk, wv, wo, wfc, wproj, gatt, gmlp):
    """Fold rotary pair-swap + RMSNorm gammas into the weights, fuse QKV."""
    C = N_EMBD
    perm = np.arange(C) ^ 1               # adjacent-pair swap of output features
    wq_t = wq.T[:, perm]                  # pure column permutation (bit-exact)
    wk_t = wk.T[:, perm]
    wv_t = wv.T
    g_att = gatt.astype(jnp.float32)[:, None]
    g_mlp = gmlp.astype(jnp.float32)[:, None]
    wqkv_t = (jnp.concatenate([wq_t, wk_t, wv_t], axis=1).astype(jnp.float32)
              * g_att).astype(jnp.bfloat16)            # (C, 3C)
    wfc_t = (wfc.T.astype(jnp.float32) * g_mlp).astype(jnp.bfloat16)  # (C, 8C)
    return wqkv_t, wo.T, wfc_t, wproj.T


# ----------------------------------------------------------------------------
# Plain-JAX reference (PyTorch-faithful), for a numeric sanity check.
# ----------------------------------------------------------------------------
def block_ref(x, wq, wk, wv, wo, wfc, wproj, gatt, gmlp):
    B, T, C = x.shape
    nh, hd = N_HEAD, HEAD_DIM

    def rms(a, g):
        af = a.astype(jnp.float32)
        ms = jnp.mean(af * af, axis=-1, keepdims=True)
        return (af * lax.rsqrt(ms + EPS)).astype(a.dtype) * g

    def lin(a, w):                        # w in PyTorch (out, in) layout
        return jnp.dot(a, w.T, preferred_element_type=jnp.float32).astype(a.dtype)

    hin = rms(x, gatt)
    q = lin(hin, wq).reshape(B, T, nh, hd)
    k = lin(hin, wk).reshape(B, T, nh, hd)
    v = lin(hin, wv).reshape(B, T, nh, hd)

    pos = np.arange(T, dtype=np.float32)[:, None]
    div = np.exp(np.arange(0, hd, 2, dtype=np.float32) * (-math.log(10000.0) / hd))
    emb = np.zeros((T, hd), np.float32)
    emb[:, 0::2] = np.sin(pos * div)
    emb[:, 1::2] = np.cos(pos * div)
    emb = jnp.asarray(emb).astype(x.dtype)
    sin_half, cos_half = emb[:, :hd // 2], emb[:, hd // 2:]

    def rope(a):                          # a: (B, T, nh, hd)
        at = jnp.transpose(a, (0, 2, 1, 3))
        a_even, a_odd = at[..., 0::2], at[..., 1::2]
        rot = jnp.stack((-a_odd, a_even), axis=-1)
        cs = jnp.stack((cos_half, sin_half), axis=-1)
        out = (rot * cs).reshape(at.shape)
        return jnp.transpose(out, (0, 2, 1, 3))

    q, k = rope(q), rope(k)

    qh = jnp.transpose(q, (0, 2, 1, 3))
    kh = jnp.transpose(k, (0, 2, 1, 3))
    vh = jnp.transpose(v, (0, 2, 1, 3))
    s = jnp.einsum('bhqd,bhkd->bhqk', qh, kh,
                   preferred_element_type=jnp.float32) / math.sqrt(hd)
    causal = np.tril(np.ones((T, T), bool))
    s = jnp.where(causal, s, -jnp.inf)
    p = jax.nn.softmax(s, axis=-1)
    y = jnp.einsum('bhqk,bhkd->bhqd', p.astype(x.dtype), vh,
                   preferred_element_type=jnp.float32).astype(x.dtype)
    y = jnp.transpose(y, (0, 2, 1, 3)).reshape(B, T, C)
    x1 = x + lin(y, wo)

    hin2 = rms(x1, gmlp)
    uv = lin(hin2, wfc)
    u, vg = uv[..., :4 * C], uv[..., 4 * C:]
    xm = u * (vg * jax.nn.sigmoid(vg))
    return x1 + lin(xm, wproj)


if __name__ == "__main__":
    # config: n_embd=32, n_head=4, norm_mode='baseline', bias=False
    # TODO(synk): 'ngpt'/'dotprod' norm_mode branches are not exercised here.
    B, T, C = 2, 8, N_EMBD
    key = jax.random.PRNGKey(0)
    kx, kp = jax.random.split(key)
    x = jax.random.normal(kx, (B, T, C), jnp.float32).astype(jnp.bfloat16)

    raw_params = init_params(kp, C)
    kernel_params = prepare_kernel_params(*raw_params)
    rot = make_rot_mult(B, T, HEAD_DIM, N_HEAD)
    mask = make_causal_mask(B, T)

    out = block_forward(x, rot, mask, *kernel_params)
    out = jax.block_until_ready(out)

    ref = block_ref(x, *raw_params)
    np.testing.assert_allclose(np.asarray(out, dtype=np.float32),
                               np.asarray(ref, dtype=np.float32),
                               rtol=5e-2, atol=5e-2)
    print("KERNEL_OK")
</pallas_src>

<mosaic_0001>
module attributes {stable_mosaic.version = 11 : i64} {
  func.func @_block_kernel(%arg0: i32, %arg1: memref<16x32xbf16, #tpu.memory_space<vmem>>, %arg2: memref<16x32xf32, #tpu.memory_space<vmem>>, %arg3: memref<16x16xf32, #tpu.memory_space<vmem>>, %arg4: memref<32x96xbf16, #tpu.memory_space<vmem>>, %arg5: memref<32x32xbf16, #tpu.memory_space<vmem>>, %arg6: memref<32x256xbf16, #tpu.memory_space<vmem>>, %arg7: memref<128x32xbf16, #tpu.memory_space<vmem>>, %arg8: memref<16x32xbf16, #tpu.memory_space<vmem>>) attributes {dimension_semantics = [#tpu.dimension_semantics<arbitrary>], iteration_bounds = array<i64: 1>, scalar_prefetch = 0 : i64, scratch_operands = 0 : i64, tpu.core_type = #tpu.core_type<tc>, window_params = [{pipeline_mode = #tpu.pipeline_mode<synchronous>, transform_indices = @transform_0, window_bounds = array<i64: 16, 32>}, {pipeline_mode = #tpu.pipeline_mode<synchronous>, transform_indices = @transform_1, window_bounds = array<i64: 16, 32>}, {pipeline_mode = #tpu.pipeline_mode<synchronous>, transform_indices = @transform_2, window_bounds = array<i64: 16, 16>}, {pipeline_mode = #tpu.pipeline_mode<synchronous>, transform_indices = @transform_3, window_bounds = array<i64: 32, 96>}, {pipeline_mode = #tpu.pipeline_mode<synchronous>, transform_indices = @transform_4, window_bounds = array<i64: 32, 32>}, {pipeline_mode = #tpu.pipeline_mode<synchronous>, transform_indices = @transform_5, window_bounds = array<i64: 32, 256>}, {pipeline_mode = #tpu.pipeline_mode<synchronous>, transform_indices = @transform_6, window_bounds = array<i64: 128, 32>}, {pipeline_mode = #tpu.pipeline_mode<synchronous>, transform_indices = @transform_7, window_bounds = array<i64: 16, 32>}]} {
    %c0 = arith.constant 0 : index
    %c0_0 = arith.constant 0 : index
    %0 = vector.load %arg1[%c0, %c0_0] : memref<16x32xbf16, #tpu.memory_space<vmem>>, vector<16x32xbf16>
    %1 = arith.extf %0 : vector<16x32xbf16> to vector<16x32xf32>
    %2 = arith.mulf %1, %1 : vector<16x32xf32>
    %cst = arith.constant dense<0.000000e+00> : vector<16xf32>
    %3 = vector.multi_reduction <add>, %2, %cst [1] : vector<16x32xf32> to vector<16xf32>
    %4 = vector.shape_cast %3 : vector<16xf32> to vector<16x1xf32>
    %cst_1 = arith.constant 3.200000e+01 : f32
    %5 = vector.broadcast %cst_1 : f32 to vector<16x1xf32>
    %6 = arith.divf %4, %5 : vector<16x1xf32>
    %cst_2 = arith.constant 9.99999997E-7 : f32
    %7 = vector.broadcast %cst_2 : f32 to vector<16x1xf32>
    %8 = arith.addf %6, %7 : vector<16x1xf32>
    %9 = math.rsqrt %8 : vector<16x1xf32>
    %10 = vector.broadcast %9 : vector<16x1xf32> to vector<16x32xf32>
    %11 = arith.mulf %1, %10 : vector<16x32xf32>
    %12 = arith.truncf %11 : vector<16x32xf32> to vector<16x32xbf16>
    %c0_3 = arith.constant 0 : index
    %c0_4 = arith.constant 0 : index
    %13 = vector.load %arg4[%c0_3, %c0_4] : memref<32x96xbf16, #tpu.memory_space<vmem>>, vector<32x96xbf16>
    %cst_5 = arith.constant dense<0.000000e+00> : vector<16x96xf32>
    %14 = tpu.matmul %12, %13, %cst_5 {dimension_numbers = #tpu.dot_dimension_numbers<[1], [0], [0], [1], [0, 0, 1, 1], [], []>} : vector<16x32xbf16>, vector<32x96xbf16>, vector<16x96xf32> -> vector<16x96xf32>
    %c0_6 = arith.constant 0 : index
    %c0_7 = arith.constant 0 : index
    %15 = vector.load %arg2[%c0_6, %c0_7] : memref<16x32xf32, #tpu.memory_space<vmem>>, vector<16x32xf32>
    %16 = vector.extract_strided_slice %14 {offsets = [0, 0], sizes = [16, 32], strides = [1, 1]} : vector<16x96xf32> to vector<16x32xf32>
    %17 = arith.mulf %15, %16 : vector<16x32xf32>
    %cst_8 = arith.constant 0.353553385 : f32
    %18 = vector.broadcast %cst_8 : f32 to vector<16x32xf32>
    %19 = arith.mulf %17, %18 : vector<16x32xf32>
    %20 = arith.truncf %19 : vector<16x32xf32> to vector<16x32xbf16>
    %21 = vector.extract_strided_slice %14 {offsets = [0, 32], sizes = [16, 32], strides = [1, 1]} : vector<16x96xf32> to vector<16x32xf32>
    %22 = arith.mulf %15, %21 : vector<16x32xf32>
    %23 = arith.truncf %22 : vector<16x32xf32> to vector<16x32xbf16>
    %24 = vector.extract_strided_slice %14 {offsets = [0, 64], sizes = [16, 32], strides = [1, 1]} : vector<16x96xf32> to vector<16x32xf32>
    %25 = arith.truncf %24 : vector<16x32xf32> to vector<16x32xbf16>
    %c0_9 = arith.constant 0 : index
    %c0_10 = arith.constant 0 : index
    %26 = vector.load %arg3[%c0_9, %c0_10] : memref<16x16xf32, #tpu.memory_space<vmem>>, vector<16x16xf32>
    %c0_11 = arith.constant 0 : index
    %c0_12 = arith.constant 0 : index
    %27 = vector.load %arg5[%c0_11, %c0_12] : memref<32x32xbf16, #tpu.memory_space<vmem>>, vector<32x32xbf16>
    %28 = vector.extract_strided_slice %20 {offsets = [0, 0], sizes = [16, 8], strides = [1, 1]} : vector<16x32xbf16> to vector<16x8xbf16>
    %29 = vector.extract_strided_slice %23 {offsets = [0, 0], sizes = [16, 8], strides = [1, 1]} : vector<16x32xbf16> to vector<16x8xbf16>
    %30 = vector.extract_strided_slice %25 {offsets = [0, 0], sizes = [16, 8], strides = [1, 1]} : vector<16x32xbf16> to vector<16x8xbf16>
    %cst_13 = arith.constant dense<0.000000e+00> : vector<16x16xf32>
    %31 = tpu.matmul %28, %29, %cst_13 {dimension_numbers = #tpu.dot_dimension_numbers<[1], [1], [0], [0], [0, 0, 1, 0], [], []>} : vector<16x8xbf16>, vector<16x8xbf16>, vector<16x16xf32> -> vector<16x16xf32>
    %32 = arith.addf %31, %26 : vector<16x16xf32>
    %cst_14 = arith.constant dense<0xFF800000> : vector<16xf32>
    %33 = vector.multi_reduction <maximumf>, %32, %cst_14 [1] : vector<16x16xf32> to vector<16xf32>
    %34 = vector.shape_cast %33 : vector<16xf32> to vector<16x1xf32>
    %35 = vector.broadcast %34 : vector<16x1xf32> to vector<16x16xf32>
    %36 = arith.subf %32, %35 : vector<16x16xf32>
    %37 = math.exp %36 : vector<16x16xf32>
    %cst_15 = arith.constant dense<0.000000e+00> : vector<16xf32>
    %38 = vector.multi_reduction <add>, %37, %cst_15 [1] : vector<16x16xf32> to vector<16xf32>
    %39 = vector.shape_cast %38 : vector<16xf32> to vector<16x1xf32>
    %40 = tpu.reciprocal %39 {approx = true} : vector<16x1xf32> -> vector<16x1xf32>
    %41 = vector.broadcast %40 : vector<16x1xf32> to vector<16x16xf32>
    %42 = arith.mulf %37, %41 : vector<16x16xf32>
    %43 = arith.truncf %42 : vector<16x16xf32> to vector<16x16xbf16>
    %cst_16 = arith.constant dense<0.000000e+00> : vector<16x8xf32>
    %44 = tpu.matmul %43, %30, %cst_16 {dimension_numbers = #tpu.dot_dimension_numbers<[1], [0], [0], [1], [0, 0, 1, 1], [], []>} : vector<16x16xbf16>, vector<16x8xbf16>, vector<16x8xf32> -> vector<16x8xf32>
    %45 = arith.truncf %44 : vector<16x8xf32> to vector<16x8xbf16>
    %46 = vector.extract_strided_slice %27 {offsets = [0, 0], sizes = [8, 32], strides = [1, 1]} : vector<32x32xbf16> to vector<8x32xbf16>
    %cst_17 = arith.constant dense<0.000000e+00> : vector<16x32xf32>
    %47 = tpu.matmul %45, %46, %cst_17 {dimension_numbers = #tpu.dot_dimension_numbers<[1], [0], [0], [1], [0, 0, 1, 1], [], []>} : vector<16x8xbf16>, vector<8x32xbf16>, vector<16x32xf32> -> vector<16x32xf32>
    %48 = vector.extract_strided_slice %20 {offsets = [0, 8], sizes = [16, 8], strides = [1, 1]} : vector<16x32xbf16> to vector<16x8xbf16>
    %49 = vector.extract_strided_slice %23 {offsets = [0, 8], sizes = [16, 8], strides = [1, 1]} : vector<16x32xbf16> to vector<16x8xbf16>
    %50 = vector.extract_strided_slice %25 {offsets = [0, 8], sizes = [16, 8], strides = [1, 1]} : vector<16x32xbf16> to vector<16x8xbf16>
    %cst_18 = arith.constant dense<0.000000e+00> : vector<16x16xf32>
    %51 = tpu.matmul %48, %49, %cst_18 {dimension_numbers = #tpu.dot_dimension_numbers<[1], [1], [0], [0], [0, 0, 1, 0], [], []>} : vector<16x8xbf16>, vector<16x8xbf16>, vector<16x16xf32> -> vector<16x16xf32>
    %52 = arith.addf %51, %26 : vector<16x16xf32>
    %cst_19 = arith.constant dense<0xFF800000> : vector<16xf32>
    %53 = vector.multi_reduction <maximumf>, %52, %cst_19 [1] : vector<16x16xf32> to vector<16xf32>
    %54 = vector.shape_cast %53 : vector<16xf32> to vector<16x1xf32>
    %55 = vector.broadcast %54 : vector<16x1xf32> to vector<16x16xf32>
    %56 = arith.subf %52, %55 : vector<16x16xf32>
    %57 = math.exp %56 : vector<16x16xf32>
    %cst_20 = arith.constant dense<0.000000e+00> : vector<16xf32>
    %58 = vector.multi_reduction <add>, %57, %cst_20 [1] : vector<16x16xf32> to vector<16xf32>
    %59 = vector.shape_cast %58 : vector<16xf32> to vector<16x1xf32>
    %60 = tpu.reciprocal %59 {approx = true} : vector<16x1xf32> -> vector<16x1xf32>
    %61 = vector.broadcast %60 : vector<16x1xf32> to vector<16x16xf32>
    %62 = arith.mulf %57, %61 : vector<16x16xf32>
    %63 = arith.truncf %62 : vector<16x16xf32> to vector<16x16xbf16>
    %cst_21 = arith.constant dense<0.000000e+00> : vector<16x8xf32>
    %64 = tpu.matmul %63, %50, %cst_21 {dimension_numbers = #tpu.dot_dimension_numbers<[1], [0], [0], [1], [0, 0, 1, 1], [], []>} : vector<16x16xbf16>, vector<16x8xbf16>, vector<16x8xf32> -> vector<16x8xf32>
    %65 = arith.truncf %64 : vector<16x8xf32> to vector<16x8xbf16>
    %66 = vector.extract_strided_slice %27 {offsets = [8, 0], sizes = [8, 32], strides = [1, 1]} : vector<32x32xbf16> to vector<8x32xbf16>
    %cst_22 = arith.constant dense<0.000000e+00> : vector<16x32xf32>
    %67 = tpu.matmul %65, %66, %cst_22 {dimension_numbers = #tpu.dot_dimension_numbers<[1], [0], [0], [1], [0, 0, 1, 1], [], []>} : vector<16x8xbf16>, vector<8x32xbf16>, vector<16x32xf32> -> vector<16x32xf32>
    %68 = arith.addf %47, %67 : vector<16x32xf32>
    %69 = vector.extract_strided_slice %20 {offsets = [0, 16], sizes = [16, 8], strides = [1, 1]} : vector<16x32xbf16> to vector<16x8xbf16>
    %70 = vector.extract_strided_slice %23 {offsets = [0, 16], sizes = [16, 8], strides = [1, 1]} : vector<16x32xbf16> to vector<16x8xbf16>
    %71 = vector.extract_strided_slice %25 {offsets = [0, 16], sizes = [16, 8], strides = [1, 1]} : vector<16x32xbf16> to vector<16x8xbf16>
    %cst_23 = arith.constant dense<0.000000e+00> : vector<16x16xf32>
    %72 = tpu.matmul %69, %70, %cst_23 {dimension_numbers = #tpu.dot_dimension_numbers<[1], [1], [0], [0], [0, 0, 1, 0], [], []>} : vector<16x8xbf16>, vector<16x8xbf16>, vector<16x16xf32> -> vector<16x16xf32>
    %73 = arith.addf %72, %26 : vector<16x16xf32>
    %cst_24 = arith.constant dense<0xFF800000> : vector<16xf32>
    %74 = vector.multi_reduction <maximumf>, %73, %cst_24 [1] : vector<16x16xf32> to vector<16xf32>
    %75 = vector.shape_cast %74 : vector<16xf32> to vector<16x1xf32>
    %76 = vector.broadcast %75 : vector<16x1xf32> to vector<16x16xf32>
    %77 = arith.subf %73, %76 : vector<16x16xf32>
    %78 = math.exp %77 : vector<16x16xf32>
    %cst_25 = arith.constant dense<0.000000e+00> : vector<16xf32>
    %79 = vector.multi_reduction <add>, %78, %cst_25 [1] : vector<16x16xf32> to vector<16xf32>
    %80 = vector.shape_cast %79 : vector<16xf32> to vector<16x1xf32>
    %81 = tpu.reciprocal %80 {approx = true} : vector<16x1xf32> -> vector<16x1xf32>
    %82 = vector.broadcast %81 : vector<16x1xf32> to vector<16x16xf32>
    %83 = arith.mulf %78, %82 : vector<16x16xf32>
    %84 = arith.truncf %83 : vector<16x16xf32> to vector<16x16xbf16>
    %cst_26 = arith.constant dense<0.000000e+00> : vector<16x8xf32>
    %85 = tpu.matmul %84, %71, %cst_26 {dimension_numbers = #tpu.dot_dimension_numbers<[1], [0], [0], [1], [0, 0, 1, 1], [], []>} : vector<16x16xbf16>, vector<16x8xbf16>, vector<16x8xf32> -> vector<16x8xf32>
    %86 = arith.truncf %85 : vector<16x8xf32> to vector<16x8xbf16>
    %87 = vector.extract_strided_slice %27 {offsets = [16, 0], sizes = [8, 32], strides = [1, 1]} : vector<32x32xbf16> to vector<8x32xbf16>
    %cst_27 = arith.constant dense<0.000000e+00> : vector<16x32xf32>
    %88 = tpu.matmul %86, %87, %cst_27 {dimension_numbers = #tpu.dot_dimension_numbers<[1], [0], [0], [1], [0, 0, 1, 1], [], []>} : vector<16x8xbf16>, vector<8x32xbf16>, vector<16x32xf32> -> vector<16x32xf32>
    %89 = arith.addf %68, %88 : vector<16x32xf32>
    %90 = vector.extract_strided_slice %20 {offsets = [0, 24], sizes = [16, 8], strides = [1, 1]} : vector<16x32xbf16> to vector<16x8xbf16>
    %91 = vector.extract_strided_slice %23 {offsets = [0, 24], sizes = [16, 8], strides = [1, 1]} : vector<16x32xbf16> to vector<16x8xbf16>
    %92 = vector.extract_strided_slice %25 {offsets = [0, 24], sizes = [16, 8], strides = [1, 1]} : vector<16x32xbf16> to vector<16x8xbf16>
    %cst_28 = arith.constant dense<0.000000e+00> : vector<16x16xf32>
    %93 = tpu.matmul %90, %91, %cst_28 {dimension_numbers = #tpu.dot_dimension_numbers<[1], [1], [0], [0], [0, 0, 1, 0], [], []>} : vector<16x8xbf16>, vector<16x8xbf16>, vector<16x16xf32> -> vector<16x16xf32>
    %94 = arith.addf %93, %26 : vector<16x16xf32>
    %cst_29 = arith.constant dense<0xFF800000> : vector<16xf32>
    %95 = vector.multi_reduction <maximumf>, %94, %cst_29 [1] : vector<16x16xf32> to vector<16xf32>
    %96 = vector.shape_cast %95 : vector<16xf32> to vector<16x1xf32>
    %97 = vector.broadcast %96 : vector<16x1xf32> to vector<16x16xf32>
    %98 = arith.subf %94, %97 : vector<16x16xf32>
    %99 = math.exp %98 : vector<16x16xf32>
    %cst_30 = arith.constant dense<0.000000e+00> : vector<16xf32>
    %100 = vector.multi_reduction <add>, %99, %cst_30 [1] : vector<16x16xf32> to vector<16xf32>
    %101 = vector.shape_cast %100 : vector<16xf32> to vector<16x1xf32>
    %102 = tpu.reciprocal %101 {approx = true} : vector<16x1xf32> -> vector<16x1xf32>
    %103 = vector.broadcast %102 : vector<16x1xf32> to vector<16x16xf32>
    %104 = arith.mulf %99, %103 : vector<16x16xf32>
    %105 = arith.truncf %104 : vector<16x16xf32> to vector<16x16xbf16>
    %cst_31 = arith.constant dense<0.000000e+00> : vector<16x8xf32>
    %106 = tpu.matmul %105, %92, %cst_31 {dimension_numbers = #tpu.dot_dimension_numbers<[1], [0], [0], [1], [0, 0, 1, 1], [], []>} : vector<16x16xbf16>, vector<16x8xbf16>, vector<16x8xf32> -> vector<16x8xf32>
    %107 = arith.truncf %106 : vector<16x8xf32> to vector<16x8xbf16>
    %108 = vector.extract_strided_slice %27 {offsets = [24, 0], sizes = [8, 32], strides = [1, 1]} : vector<32x32xbf16> to vector<8x32xbf16>
    %cst_32 = arith.constant dense<0.000000e+00> : vector<16x32xf32>
    %109 = tpu.matmul %107, %108, %cst_32 {dimension_numbers = #tpu.dot_dimension_numbers<[1], [0], [0], [1], [0, 0, 1, 1], [], []>} : vector<16x8xbf16>, vector<8x32xbf16>, vector<16x32xf32> -> vector<16x32xf32>
    %110 = arith.addf %89, %109 : vector<16x32xf32>
    %111 = arith.addf %1, %110 : vector<16x32xf32>
    %112 = arith.mulf %111, %111 : vector<16x32xf32>
    %cst_33 = arith.constant dense<0.000000e+00> : vector<16xf32>
    %113 = vector.multi_reduction <add>, %112, %cst_33 [1] : vector<16x32xf32> to vector<16xf32>
    %114 = vector.shape_cast %113 : vector<16xf32> to vector<16x1xf32>
    %cst_34 = arith.constant 3.200000e+01 : f32
    %115 = vector.broadcast %cst_34 : f32 to vector<16x1xf32>
    %116 = arith.divf %114, %115 : vector<16x1xf32>
    %cst_35 = arith.constant 9.99999997E-7 : f32
    %117 = vector.broadcast %cst_35 : f32 to vector<16x1xf32>
    %118 = arith.addf %116, %117 : vector<16x1xf32>
    %119 = math.rsqrt %118 : vector<16x1xf32>
    %120 = vector.broadcast %119 : vector<16x1xf32> to vector<16x32xf32>
    %121 = arith.mulf %111, %120 : vector<16x32xf32>
    %122 = arith.truncf %121 : vector<16x32xf32> to vector<16x32xbf16>
    %c0_36 = arith.constant 0 : index
    %c0_37 = arith.constant 0 : index
    %123 = vector.load %arg6[%c0_36, %c0_37] : memref<32x256xbf16, #tpu.memory_space<vmem>>, vector<32x256xbf16>
    %cst_38 = arith.constant dense<0.000000e+00> : vector<16x256xf32>
    %124 = tpu.matmul %122, %123, %cst_38 {dimension_numbers = #tpu.dot_dimension_numbers<[1], [0], [0], [1], [0, 0, 1, 1], [], []>} : vector<16x32xbf16>, vector<32x256xbf16>, vector<16x256xf32> -> vector<16x256xf32>
    %125 = vector.extract_strided_slice %124 {offsets = [0, 0], sizes = [16, 128], strides = [1, 1]} : vector<16x256xf32> to vector<16x128xf32>
    %126 = vector.extract_strided_slice %124 {offsets = [0, 128], sizes = [16, 128], strides = [1, 1]} : vector<16x256xf32> to vector<16x128xf32>
    %127 = arith.negf %126 : vector<16x128xf32>
    %128 = math.exp %127 : vector<16x128xf32>
    %cst_39 = arith.constant 1.000000e+00 : f32
    %129 = vector.broadcast %cst_39 : f32 to vector<16x128xf32>
    %130 = arith.addf %129, %128 : vector<16x128xf32>
    %131 = arith.divf %129, %130 : vector<16x128xf32>
    %132 = arith.mulf %126, %131 : vector<16x128xf32>
    %133 = arith.mulf %125, %132 : vector<16x128xf32>
    %134 = arith.truncf %133 : vector<16x128xf32> to vector<16x128xbf16>
    %c0_40 = arith.constant 0 : index
    %c0_41 = arith.constant 0 : index
    %135 = vector.load %arg7[%c0_40, %c0_41] : memref<128x32xbf16, #tpu.memory_space<vmem>>, vector<128x32xbf16>
    %cst_42 = arith.constant dense<0.000000e+00> : vector<16x32xf32>
    %136 = tpu.matmul %134, %135, %cst_42 {dimension_numbers = #tpu.dot_dimension_numbers<[1], [0], [0], [1], [0, 0, 1, 1], [], []>} : vector<16x128xbf16>, vector<128x32xbf16>, vector<16x32xf32> -> vector<16x32xf32>
    %137 = arith.addf %111, %136 : vector<16x32xf32>
    %138 = arith.truncf %137 : vector<16x32xf32> to vector<16x32xbf16>
    %c0_43 = arith.constant 0 : index
    %c0_44 = arith.constant 0 : index
    %139 = vector.load %arg8[%c0_43, %c0_44] : memref<16x32xbf16, #tpu.memory_space<vmem>>, vector<16x32xbf16>
    tpu.vector_store %arg8[%c0_43, %c0_44], %138 {strides = array<i32>} : memref<16x32xbf16, #tpu.memory_space<vmem>>, vector<16x32xbf16>,
    return
  }
  func.func @transform_0(%arg0: i32) -> (i32, i32) {
    %c0_i32 = arith.constant 0 : i32
    %c0_i32_0 = arith.constant 0 : i32
    %c0_i32_1 = arith.constant 0 : i32
    return %c0_i32, %c0_i32_0 : i32, i32
  }
  func.func @transform_1(%arg0: i32) -> (i32, i32) {
    %c0_i32 = arith.constant 0 : i32
    %c0_i32_0 = arith.constant 0 : i32
    %c0_i32_1 = arith.constant 0 : i32
    return %c0_i32, %c0_i32_0 : i32, i32
  }
  func.func @transform_2(%arg0: i32) -> (i32, i32) {
    %c0_i32 = arith.constant 0 : i32
    %c0_i32_0 = arith.constant 0 : i32
    %c0_i32_1 = arith.constant 0 : i32
    return %c0_i32, %c0_i32_0 : i32, i32
  }
  func.func @transform_3(%arg0: i32) -> (i32, i32) {
    %c0_i32 = arith.constant 0 : i32
    %c0_i32_0 = arith.constant 0 : i32
    %c0_i32_1 = arith.constant 0 : i32
    return %c0_i32, %c0_i32_0 : i32, i32
  }
  func.func @transform_4(%arg0: i32) -> (i32, i32) {
    %c0_i32 = arith.constant 0 : i32
    %c0_i32_0 = arith.constant 0 : i32
    %c0_i32_1 = arith.constant 0 : i32
    return %c0_i32, %c0_i32_0 : i32, i32
  }
  func.func @transform_5(%arg0: i32) -> (i32, i32) {
    %c0_i32 = arith.constant 0 : i32
    %c0_i32_0 = arith.constant 0 : i32
    %c0_i32_1 = arith.constant 0 : i32
    return %c0_i32, %c0_i32_0 : i32, i32
  }
  func.func @transform_6(%arg0: i32) -> (i32, i32) {
    %c0_i32 = arith.constant 0 : i32
    %c0_i32_0 = arith.constant 0 : i32
    %c0_i32_1 = arith.constant 0 : i32
    return %c0_i32, %c0_i32_0 : i32, i32
  }
  func.func @transform_7(%arg0: i32) -> (i32, i32) {
    %c0_i32 = arith.constant 0 : i32
    %c0_i32_0 = arith.constant 0 : i32
    %c0_i32_1 = arith.constant 0 : i32
    return %c0_i32, %c0_i32_0 : i32, i32
  }
}

</mosaic_0001>

<bundles_post_ra>
// kernel: tpu_custom_call.1
= control target key start
LH: loop header
LB: loop body
LE: loop exit
PB: predicated region body
PF: predicated region fallthrough
CT: control target
= control target key end

     0   :  { %12 = vsyncpa [#allocation3], 0  ;;  %s1693_s0 = inlined_call_operand.hbm [shape: bf16[16,32], index: 0, kind: input, shape index: {}]   ;;  %s1694_s1 = inlined_call_operand.vmem [shape: f32[16,32], index: 1, kind: input, shape index: {}]   ;;  %s1695_s2 = inlined_call_operand.vmem [shape: f32[16,16], index: 2, kind: input, shape index: {}]   ;;  %s1696_s3 = inlined_call_operand.vmem [shape: bf16[32,96], index: 3, kind: input, shape index: {}]   ;;  %s1697_s4 = inlined_call_operand.hbm [shape: bf16[32,32], index: 4, kind: input, shape index: {}]   ;;  %s1698_s5 = inlined_call_operand.vmem [shape: bf16[32,256], index: 5, kind: input, shape index: {}]   ;;  %s1699_s6 = inlined_call_operand.vmem [shape: bf16[128,32], index: 6, kind: input, shape index: {}]   ;;  %s1700_s7 = inlined_call_operand.hbm [shape: bf16[16,32], index: 7, kind: output, shape index: {}]  }
   0x1   :  { %13 = vsyncpa [#allocation6], 0 }
   0x2   :  { %14 = vsyncpa [#allocation4], 0  ;;  %s1407_s24 = smov [#allocation2]  }
   0x3   :  { %s20_s25 = sshll.u32 %s1407_s24, 4  ;;  %s21_s25 = int_to_ptr.vmem [resolvable:$true] %s20_s25 }
   0x4   :  { %s1349_s26 = scalar_lea.vmem %s21_s25, 128  ;;  %p1354_p1 = scmp.lt.s32.totalorder %s21_s25, %s21_s25 }
   0x5   :  { %p1350_p0 = scmp.ne.s32.totalorder %s21_s25, %s1349_s26  ;;  %p1355_p2 = scmp.lt.s32.totalorder %s1349_s26, %s1349_s26 }
   0x7   :  { %p1356_p3 = por %p1355_p2, %p1354_p1 }
   0x9   :  { %p1357_p4 = pnand %p1356_p3, %p1350_p0 }
   0xb   :  { %1360 = shalt.err (!%p1357_p4)
}
   0xc   :  { %s1408_s27 = smov 64   ;;  %s1409_s28 = smov 4  }
   0xd   :  { %26 = dma.hbm_to_vmem [thread:$0]  %s1693_s0, 128, %s21_s25, [#allocation3], %s1408_s27, %s1408_s27, %s1409_s28  }
   0xe   :  { %s1410_s8 = smov [#allocation5]  }
   0xf   :  { %s38_s9 = sshll.u32 %s1410_s8, 4  ;;  %s39_s9 = int_to_ptr.vmem [resolvable:$true] %s38_s9 }
  0x10   :  { %s1369_s10 = scalar_lea.vmem %s39_s9, 256  ;;  %p1374_p6 = scmp.lt.s32.totalorder %s39_s9, %s39_s9 }
  0x11   :  { %p1370_p5 = scmp.ne.s32.totalorder %s39_s9, %s1369_s10  ;;  %p1375_p7 = scmp.lt.s32.totalorder %s1369_s10, %s1369_s10 }
  0x13   :  { %p1376_p8 = por %p1375_p7, %p1374_p6 }
  0x15   :  { %p1377_p9 = pnand %p1376_p8, %p1370_p5 }
  0x17   :  { %1380 = shalt.err (!%p1377_p9)
}
  0x18   :  { %44 = dma.hbm_to_vmem [thread:$0]  %s1697_s4, 256, %s39_s9, [#allocation6], %s1408_s27, %s1408_s27, %s1409_s28  }
  0x19   :  { %1401 = dma.done.wait [#allocation3], 128  }
  0x1a   :  { %1402 = vsyncadd [#allocation3], 4294967168 }
  0x1b   :  { %1403 = dma.done.wait [#allocation6], 256  }
  0x1c   :  { %1404 = vsyncadd [#allocation6], 4294967040  ;;  %v1123_v0 = vld [vmem:[#allocation2] sm:$0xff]   ;;  %vm62_vm0 = vcmask 261120   ;;  %v1277_v7 = vld [vmem:[%s1696_s3 + $0x8] sm:$0xff]   ;;  %v1411_v8 = vmov 0.0  }
  0x1d   :  { %v1474_v1 = vunpack.c.l.bf16 %v1123_v0  ;;  %v1476_v2 = vunpack.c.h.bf16 %v1123_v0  ;;  %1162 = vmatprep.subr.bf16.mxu1 %v1411_v8  ;;  %vm1412_vm1 = vmmov 0   ;;  %v1278_v9 = vld [vmem:[%s1696_s3] sm:$0xff]   ;;  %1188 = vmatprep.subr.bf16.mxu0 %v1411_v8  ;;  %s1413_s16 = smov 96   ;;  %v140_v24 = vld [vmem:[%s1694_s1 + $0x8] sm:$0xff]  ;;  %vm164_vm2 = vcmask 64512   ;;  %s1414_s22 = smov 120  }
  0x1e   :  { %1166 = vmatprep.mubr.msk.bf16.mxu1 %vm1412_vm1, %v1411_v8  ;;  %1163 = vmatpush3.bf16.msra.mxu1 %v1277_v7  ;;  %v139_v22 = vld [vmem:[%s1694_s1] sm:$0xff]  ;;  %vm212_vm3 = vcmask 130048   ;;  %v1531_v43 = vld [vmem:[%s1695_s2 + $0x8] sm:$0xff]  ;;  %s1416_s23 = smov 56   ;;  %vm412_vm4 = vcmask 1043456   ;;  %s1417_s24 = smov 104  }
  0x1f   :  { %v60_v3 = vmul.f32 %v1474_v1, %v1474_v1  ;;  %v61_v4 = vmul.f32 %v1476_v2, %v1476_v2  ;;  %1164 = vmatprep.subr.bf16.mxu1 %v1411_v8  ;;  %1190 = vmatprep.mubr.msk.bf16.mxu0 %vm1412_vm1, %v1411_v8  ;;  %v1525_v39 = vld [vmem:[%s1695_s2] sm:$0xff]  ;;  %s1415_s2 = smov 112   ;;  %s1418_s25 = smov 48   ;;  %vm1067_vm5 = vcmask 257024  }
  0x20   :  { %s1419_s26 = smov 40  }
  0x21   :  { %v63_v5 = vsel %vm62_vm0, %v60_v3, 0.0  ;;  %v66_v6 = vsel %vm62_vm0, %v61_v4, 0.0 }
  0x22   :  { %64 = vadd.xlane.f32.xlu0 %v63_v5  ;;  %1165 = vmatpush3.bf16.msra.mxu1 %v1278_v9 }
  0x23   :  { %1170 = vmatprep.subr.bf16.mxu1 %v1411_v8 }
  0x26   :  { %67 = vadd.xlane.f32.xlu0 %v66_v6 }
  0xab   :  { %v65_v10 = vpop.xlane.xlu0 %64 }
  0xac   :  { %v70_v11 = vmul.f32 0.03125, %v65_v10 }
  0xae   :  { %v72_v12 = vadd.f32 1e-06, %v70_v11 }
  0xaf   :  { %v68_v13 = vpop.xlane.xlu0 %67 }
  0xb0   :  { %v71_v14 = vmul.f32 0.03125, %v68_v13  ;;  %1293 = vrsqrt.f32 %v72_v12 }
  0xb2   :  { %v73_v15 = vadd.f32 1e-06, %v71_v14 }
  0xb4   :  { %1295 = vrsqrt.f32 %v73_v15 }
  0xbd   :  { %v1294_v16 = vpop.eup %1293 }
  0xbe   :  { %v76_v18 = vmul.f32 %v1294_v16, %v1474_v1 }
  0xc1   :  { %v1296_v17 = vpop.eup %1295 }
  0xc2   :  { %v77_v19 = vmul.f32 %v1296_v17, %v1476_v2 }
  0xc4   :  { %v78_v20 = vpack.c.bf16 %v77_v19, %v76_v18 }
  0xc6   :  { %1167 = vmatmul.mubr.msk.bf16.vlgmr.msra.gmra.mxu1 %vm62_vm0, %v78_v20 }
  0xc7   :  { %1172 = vmatprep.mubr.msk.bf16.mxu1 %vm1412_vm1, %v1411_v8 }
 0x186   :  { %v132_v21 = vpop.f32.mrf.mxu1 }
 0x187   :  { %148 = vrot.lane.b32.xlu1 %v132_v21, %s1413_s16  ;;  %v141_v25 = vmul.f32 %v139_v22, %v132_v21 }
 0x188   :  { %v1168_v23 = vpop.f32.mrf.mxu1 }
 0x189   :  { %v143_v30 = vmul.f32 0.35355338, %v141_v25 }
 0x18a   :  { %v135_v26 = vpop.f32.mrf.mxu1 }
 0x18b   :  { %v1509_v27 = vpack.c.bf16 %v135_v26, %v132_v21  ;;  %150 = vrot.lane.b32.xlu1 %v135_v26, %s1413_s16  ;;  %v142_v28 = vmul.f32 %v140_v24, %v135_v26 }
 0x18c   :  { %v1169_v29 = vpop.f32.mrf.mxu1 }
 0x18d   :  { %v144_v31 = vmul.f32 0.35355338, %v142_v28 }
 0x18f   :  { %v1511_v32 = vpack.c.bf16 %v144_v31, %v143_v30 }
 0x1f9   :  { %v149_v33 = vpop.permute.xlu1 %148 }
 0x1fa   :  { %v154_v35 = vmul.f32 %v149_v33, %v139_v22 }
 0x1fd   :  { %v151_v34 = vpop.permute.xlu1 %150 }
 0x1fe   :  { %v155_v36 = vmul.f32 %v151_v34, %v140_v24 }
 0x200   :  { %v1513_v37 = vpack.c.bf16 %v155_v36, %v154_v35 }
 0x202   :  { %v169_v38 = vsel %vm164_vm2, %v1513_v37, 0 }
 0x203   :  { %1171 = vmatpush3.bf16.xpose.msra.mxu1 %v169_v38 }
 0x204   :  { %1176 = vmatprep.subr.bf16.mxu1 %v1411_v8 }
 0x20a   :  { %1173 = vmatmul.mubr.msk.bf16.vlgmr.msra.gmra.mxu1 %vm164_vm2, %v1511_v32 }
 0x20b   :  { %1178 = vmatprep.mubr.msk.bf16.mxu1 %vm1412_vm1, %v1411_v8 }
 0x2ca   :  { %v205_v40 = vpop.f32.mrf.mxu1 }
 0x2cb   :  { %v206_v41 = vadd.f32 %v205_v40, %v1525_v39 }
 0x2cc   :  { %v1174_v42 = vpop.f32.mrf.mxu1 }
 0x2cd   :  { %v213_v44 = vsel %vm212_vm3, %v206_v41, -inf }
 0x2ce   :  { %214 = vmax.xlane.f32.xlu0 %v213_v44  ;;  %v208_v45 = vpop.f32.mrf.mxu1 }
 0x2cf   :  { %v209_v46 = vadd.f32 %v208_v45, %v1531_v43 }
 0x2d0   :  { %v1175_v47 = vpop.f32.mrf.mxu1 }
 0x2d1   :  { %v216_v48 = vsel %vm212_vm3, %v209_v46, -inf  ;;  %v161_v47 = vld [vmem:[#allocation5 + $0x4] sm:$0xf] }
 0x2d2   :  { %217 = vmax.xlane.f32.xlu1 %v216_v48  ;;  %v414_v48 = vsel %vm412_vm4, %v161_v47, 0 }
 0x2e3   :  { %286 = vrot.lane.b32.xlu1 %v1511_v32, %s1414_s22 }
 0x2e4   :  { %237 = vrot.lane.b32.xlu0 %v1509_v27, %s1408_s27 }
 0x357   :  { %v215_v49 = vpop.xlane.xlu0 %214 }
 0x358   :  { %v219_v50 = vsub.f32 %v206_v41, %v215_v49  ;;  %v160_v41 = vld [vmem:[#allocation5] sm:$0xf] }
 0x35a   :  { %v221_v51 = vmul.f32 1.442695, %v219_v50 }
 0x35b   :  { %v238_v52 = vpop.permute.xlu0 %237  ;;  %v218_v53 = vpop.xlane.xlu1 %217 }
 0x35c   :  { %1297 = vpow2.f32 %v221_v51  ;;  %v220_v54 = vsub.f32 %v209_v46, %v218_v53  ;;  %1177 = vmatpush3.bf16.msra.mxu1 %v238_v52  ;;  %v461_v46 = vsel %vm412_vm4, %v160_v41, 0 }
 0x35d   :  { %1182 = vmatprep.subr.bf16.mxu1 %v1411_v8 }
 0x35e   :  { %v223_v55 = vmul.f32 1.442695, %v220_v54 }
 0x35f   :  { %v287_v7 = vpop.permute.xlu1 %286 }
 0x360   :  { %1299 = vpow2.f32 %v223_v55 }
 0x369   :  { %v1298_v56 = vpop.eup %1297 }
 0x36a   :  { %v225_v57 = vsel %vm212_vm3, %v1298_v56, 0.0 }
 0x36b   :  { %226 = vadd.xlane.f32.xlu0 %v225_v57 }
 0x36d   :  { %v1300_v58 = vpop.eup %1299 }
 0x36e   :  { %v228_v59 = vsel %vm212_vm3, %v1300_v58, 0.0 }
 0x36f   :  { %229 = vadd.xlane.f32.xlu0 %v228_v59 }
 0x385   :  { %289 = vrot.lane.b32.xlu0 %v1513_v37, %s1414_s22 }
 0x3f4   :  { %v227_v60 = vpop.xlane.xlu0 %226 }
 0x3f5   :  { %1301 = vrcp.f32 %v227_v60 }
 0x3f8   :  { %v230_v61 = vpop.xlane.xlu0 %229 }
 0x3f9   :  { %1303 = vrcp.f32 %v230_v61 }
 0x3fc   :  { %v290_v4 = vpop.permute.xlu0 %289 }
 0x3fd   :  { %v295_v6 = vsel %vm164_vm2, %v290_v4, 0 }
 0x402   :  { %v1302_v62 = vpop.eup %1301 }
 0x403   :  { %v233_v0 = vmul.f32 %v1302_v62, %v1298_v56 }
 0x406   :  { %v1304_v63 = vpop.eup %1303 }
 0x407   :  { %v234_v3 = vmul.f32 %v1304_v63, %v1300_v58 }
 0x409   :  { %v235_v5 = vpack.c.bf16 %v234_v3, %v233_v0 }
 0x40b   :  { %1179 = vmatmul.mubr.msk.bf16.vlgmr.msra.gmra.mxu1 %vm212_vm3, %v235_v5 }
 0x40c   :  { %1183 = vmatpush3.bf16.xpose.msra.mxu1 %v295_v6  ;;  %1184 = vmatprep.mubr.msk.bf16.mxu1 %vm1412_vm1, %v1411_v8 }
 0x40d   :  { %1194 = vmatprep.subr.bf16.mxu1 %v1411_v8 }
 0x413   :  { %1185 = vmatmul.mubr.msk.bf16.vlgmr.msra.gmra.mxu1 %vm164_vm2, %v287_v7 }
 0x414   :  { %1196 = vmatprep.mubr.msk.bf16.mxu1 %vm1412_vm1, %v1411_v8  ;;  %1195 = vmatpush3.bf16.msra.mxu1 %v414_v48 }
 0x415   :  { %1206 = vmatprep.subr.bf16.mxu1 %v1411_v8 }
 0x4cb   :  { %v277_v9 = vpop.f32.mrf.mxu1 }
 0x4cd   :  { %v1180_v10 = vpop.f32.mrf.mxu1 }
 0x4cf   :  { %v280_v11 = vpop.f32.mrf.mxu1 }
 0x4d0   :  { %v284_v12 = vpack.c.bf16 %v280_v11, %v277_v9 }
 0x4d1   :  { %v1181_v13 = vpop.f32.mrf.mxu1 }
 0x4d3   :  { %v331_v14 = vpop.f32.mrf.mxu1 }
 0x4d4   :  { %v332_v15 = vadd.f32 %v331_v14, %v1525_v39 }
 0x4d5   :  { %v1186_v16 = vpop.f32.mrf.mxu1 }
 0x4d6   :  { %v338_v17 = vsel %vm212_vm3, %v332_v15, -inf }
 0x4d7   :  { %339 = vmax.xlane.f32.xlu0 %v338_v17  ;;  %v334_v18 = vpop.f32.mrf.mxu1 }
 0x4d8   :  { %v335_v19 = vadd.f32 %v334_v18, %v1531_v43 }
 0x4d9   :  { %v1187_v20 = vpop.f32.mrf.mxu1 }
 0x4da   :  { %v341_v21 = vsel %vm212_vm3, %v335_v19, -inf }
 0x4db   :  { %342 = vmax.xlane.f32.xlu1 %v341_v21 }
 0x4ec   :  { %506 = vrot.lane.b32.xlu1 %v1513_v37, %s1415_s2 }
 0x560   :  { %v340_v22 = vpop.xlane.xlu0 %339 }
 0x561   :  { %v344_v23 = vsub.f32 %v332_v15, %v340_v22 }
 0x563   :  { %v346_v24 = vmul.f32 1.442695, %v344_v23 }
 0x564   :  { %v343_v25 = vpop.xlane.xlu1 %342 }
 0x565   :  { %1305 = vpow2.f32 %v346_v24  ;;  %v345_v26 = vsub.f32 %v335_v19, %v343_v25 }
 0x567   :  { %v348_v28 = vmul.f32 1.442695, %v345_v26 }
 0x568   :  { %v507_v51 = vpop.permute.xlu1 %506 }
 0x569   :  { %1307 = vpow2.f32 %v348_v28  ;;  %v512_v55 = vsel %vm164_vm2, %v507_v51, 0 }
 0x572   :  { %v1306_v29 = vpop.eup %1305 }
 0x573   :  { %v350_v30 = vsel %vm212_vm3, %v1306_v29, 0.0 }
 0x574   :  { %351 = vadd.xlane.f32.xlu0 %v350_v30 }
 0x576   :  { %v1308_v31 = vpop.eup %1307 }
 0x577   :  { %v353_v33 = vsel %vm212_vm3, %v1308_v31, 0.0 }
 0x578   :  { %354 = vadd.xlane.f32.xlu0 %v353_v33  ;;  %v162_v33 = vld [vmem:[#allocation5 + $0x8] sm:$0xf] }
 0x58e   :  { %361 = vrot.lane.b32.xlu0 %v1509_v27, %s1416_s23 }
 0x592   :  { %504 = vrot.lane.b32.xlu0 %v1511_v32, %s1415_s2 }
 0x5fd   :  { %v352_v34 = vpop.xlane.xlu0 %351 }
 0x5fe   :  { %1309 = vrcp.f32 %v352_v34  ;;  %v630_v34 = vsel %vm412_vm4, %v162_v33, 0  ;;  %v1420_v33 = vmov 0  }
 0x601   :  { %v355_v35 = vpop.xlane.xlu0 %354 }
 0x602   :  { %1311 = vrcp.f32 %v355_v35 }
 0x605   :  { %v362_v36 = vpop.permute.xlu0 %361 }
 0x606   :  { %1189 = vmatpush3.bf16.msra.mxu0 %v362_v36 }
 0x607   :  { %1200 = vmatprep.subr.bf16.mxu0 %v1411_v8 }
 0x609   :  { %v505_v59 = vpop.permute.xlu0 %504 }
 0x60b   :  { %v1310_v38 = vpop.eup %1309 }
 0x60c   :  { %v358_v42 = vmul.f32 %v1310_v38, %v1306_v29 }
 0x60f   :  { %v1312_v40 = vpop.eup %1311 }
 0x610   :  { %v359_v44 = vmul.f32 %v1312_v40, %v1308_v31 }
 0x612   :  { %v360_v45 = vpack.c.bf16 %v359_v44, %v358_v42 }
 0x614   :  { %1191 = vmatmul.mubr.msk.bf16.vlgmr.msra.gmra.mxu0 %vm212_vm3, %v360_v45 }
 0x615   :  { %1201 = vmatpush3.bf16.msra.mxu0 %v461_v46  ;;  %1202 = vmatprep.mubr.msk.bf16.mxu0 %vm1412_vm1, %v1411_v8 }
 0x616   :  { %1212 = vmatprep.subr.bf16.mxu0 %v1411_v8 }
 0x61c   :  { %1203 = vmatmul.mubr.msk.bf16.vlgmr.msra.gmra.mxu0 %vm164_vm2, %v284_v12 }
 0x61d   :  { %1214 = vmatprep.mubr.msk.bf16.mxu0 %vm1412_vm1, %v1411_v8 }
 0x6d4   :  { %v401_v49 = vpop.f32.mrf.mxu0 }
 0x6d6   :  { %v1192_v50 = vpop.f32.mrf.mxu0 }
 0x6d8   :  { %v404_v52 = vpop.f32.mrf.mxu0 }
 0x6d9   :  { %v408_v53 = vpack.c.bf16 %v404_v52, %v401_v49 }
 0x6da   :  { %v1193_v54 = vpop.f32.mrf.mxu0 }
 0x6db   :  { %1197 = vmatmul.mubr.msk.bf16.vlgmr.msra.gmra.mxu1 %vm164_vm2, %v408_v53 }
 0x6dc   :  { %1207 = vmatpush3.bf16.xpose.msra.mxu1 %v512_v55  ;;  %v1573_v56 = vpop.f32.mrf.mxu0  ;;  %1208 = vmatprep.mubr.msk.bf16.mxu1 %vm1412_vm1, %v1411_v8 }
 0x6dd   :  { %1218 = vmatprep.subr.bf16.mxu1 %v1411_v8 }
 0x6de   :  { %v1204_v57 = vpop.f32.mrf.mxu0 }
 0x6e0   :  { %v1578_v58 = vpop.f32.mrf.mxu0 }
 0x6e2   :  { %v1205_v60 = vpop.f32.mrf.mxu0 }
 0x6e3   :  { %1209 = vmatmul.mubr.msk.bf16.vlgmr.msra.gmra.mxu1 %vm164_vm2, %v505_v59 }
 0x6e4   :  { %1220 = vmatprep.mubr.msk.bf16.mxu1 %vm1412_vm1, %v1411_v8  ;;  %1219 = vmatpush3.bf16.msra.mxu1 %v630_v34  ;;  %v1282_v34 = vld [vmem:[%s1698_s5] ss:$8 sps:$4 sm:$0xff]  }
 0x6e5   :  { %1230 = vmatprep.subr.bf16.mxu1 %v1411_v8 }
 0x79b   :  { %v1583_v61 = vpop.f32.mrf.mxu1 }
 0x79d   :  { %v1198_v62 = vpop.f32.mrf.mxu1 }
 0x79f   :  { %v1585_v63 = vpop.f32.mrf.mxu1 }
 0x7a1   :  { %v1199_v0 = vpop.f32.mrf.mxu1 }
 0x7a3   :  { %v548_v3 = vpop.f32.mrf.mxu1 }
 0x7a4   :  { %v549_v4 = vadd.f32 %v548_v3, %v1525_v39 }
 0x7a5   :  { %v1210_v5 = vpop.f32.mrf.mxu1 }
 0x7a6   :  { %v555_v6 = vsel %vm212_vm3, %v549_v4, -inf  ;;  %v501_v5 = vadd.f32 %v1578_v58, %v1585_v63 }
 0x7a7   :  { %556 = vmax.xlane.f32.xlu0 %v555_v6  ;;  %v551_v7 = vpop.f32.mrf.mxu1 }
 0x7a8   :  { %v552_v9 = vadd.f32 %v551_v7, %v1531_v43 }
 0x7a9   :  { %v1211_v10 = vpop.f32.mrf.mxu1 }
 0x7aa   :  { %v558_v11 = vsel %vm212_vm3, %v552_v9, -inf }
 0x7ab   :  { %559 = vmax.xlane.f32.xlu1 %v558_v11 }
 0x7bc   :  { %677 = vrot.lane.b32.xlu1 %v1513_v37, %s1417_s24 }
 0x7c0   :  { %675 = vrot.lane.b32.xlu1 %v1511_v32, %s1417_s24 }
 0x830   :  { %v557_v12 = vpop.xlane.xlu0 %556 }
 0x831   :  { %v561_v13 = vsub.f32 %v549_v4, %v557_v12 }
 0x833   :  { %v563_v14 = vmul.f32 1.442695, %v561_v13 }
 0x834   :  { %v560_v15 = vpop.xlane.xlu1 %559 }
 0x835   :  { %1313 = vpow2.f32 %v563_v14  ;;  %v562_v16 = vsub.f32 %v552_v9, %v560_v15 }
 0x837   :  { %v565_v17 = vmul.f32 1.442695, %v562_v16 }
 0x838   :  { %v678_v28 = vpop.permute.xlu1 %677 }
 0x839   :  { %1315 = vpow2.f32 %v565_v17  ;;  %v683_v30 = vsel %vm164_vm2, %v678_v28, 0 }
 0x83c   :  { %v676_v31 = vpop.permute.xlu1 %675 }
 0x842   :  { %v1314_v18 = vpop.eup %1313 }
 0x843   :  { %v567_v19 = vsel %vm212_vm3, %v1314_v18, 0.0 }
 0x844   :  { %568 = vadd.xlane.f32.xlu0 %v567_v19 }
 0x846   :  { %v1316_v20 = vpop.eup %1315 }
 0x847   :  { %v570_v21 = vsel %vm212_vm3, %v1316_v20, 0.0 }
 0x848   :  { %571 = vadd.xlane.f32.xlu0 %v570_v21 }
 0x85e   :  { %578 = vrot.lane.b32.xlu0 %v1509_v27, %s1418_s25 }
 0x8cd   :  { %v569_v32 = vpop.xlane.xlu0 %568 }
 0x8ce   :  { %1317 = vrcp.f32 %v569_v32 }
 0x8d1   :  { %v572_v37 = vpop.xlane.xlu0 %571 }
 0x8d2   :  { %1319 = vrcp.f32 %v572_v37 }
 0x8d5   :  { %v579_v22 = vpop.permute.xlu0 %578 }
 0x8d6   :  { %1213 = vmatpush3.bf16.msra.mxu0 %v579_v22 }
 0x8d7   :  { %1224 = vmatprep.subr.bf16.mxu0 %v1411_v8 }
 0x8db   :  { %v1318_v23 = vpop.eup %1317 }
 0x8dc   :  { %v575_v25 = vmul.f32 %v1318_v23, %v1314_v18 }
 0x8df   :  { %v1320_v24 = vpop.eup %1319 }
 0x8e0   :  { %v576_v26 = vmul.f32 %v1320_v24, %v1316_v20 }
 0x8e2   :  { %v577_v29 = vpack.c.bf16 %v576_v26, %v575_v25 }
 0x8e4   :  { %1215 = vmatmul.mubr.msk.bf16.vlgmr.msra.gmra.mxu0 %vm212_vm3, %v577_v29 }
 0x8e5   :  { %1225 = vmatpush3.bf16.xpose.msra.mxu0 %v683_v30  ;;  %1226 = vmatprep.mubr.msk.bf16.mxu0 %vm1412_vm1, %v1411_v8 }
 0x8e6   :  { %1236 = vmatprep.subr.bf16.mxu0 %v1411_v8 }
 0x8ec   :  { %1227 = vmatmul.mubr.msk.bf16.vlgmr.msra.gmra.mxu0 %vm164_vm2, %v676_v31  ;;  %v1281_v31 = vld [vmem:[%s1698_s5 + $0x14] ss:$8 sps:$4 sm:$0xff]  }
 0x8ed   :  { %1238 = vmatprep.mubr.msk.bf16.mxu0 %vm1412_vm1, %v1411_v8 }
 0x9a4   :  { %v618_v35 = vpop.f32.mrf.mxu0 }
 0x9a6   :  { %v1216_v36 = vpop.f32.mrf.mxu0 }
 0x9a8   :  { %v621_v38 = vpop.f32.mrf.mxu0 }
 0x9a9   :  { %v625_v40 = vpack.c.bf16 %v621_v38, %v618_v35 }
 0x9aa   :  { %v1217_v41 = vpop.f32.mrf.mxu0 }
 0x9ab   :  { %1221 = vmatmul.mubr.msk.bf16.vlgmr.msra.gmra.mxu1 %vm164_vm2, %v625_v40 }
 0x9ac   :  { %v719_v42 = vpop.f32.mrf.mxu0  ;;  %1232 = vmatprep.mubr.msk.bf16.mxu1 %vm1412_vm1, %v1411_v8 }
 0x9ad   :  { %v720_v44 = vadd.f32 %v719_v42, %v1525_v39 }
 0x9ae   :  { %v1228_v45 = vpop.f32.mrf.mxu0 }
 0x9af   :  { %v726_v46 = vsel %vm212_vm3, %v720_v44, -inf }
 0x9b0   :  { %727 = vmax.xlane.f32.xlu1 %v726_v46  ;;  %v722_v47 = vpop.f32.mrf.mxu0 }
 0x9b1   :  { %v723_v48 = vadd.f32 %v722_v47, %v1531_v43 }
 0x9b2   :  { %v1229_v49 = vpop.f32.mrf.mxu0 }
 0x9b3   :  { %v729_v50 = vsel %vm212_vm3, %v723_v48, -inf  ;;  %v1285_v49 = vld [vmem:[%s1699_s6 + $0x38] sm:$0xff]  }
 0x9b4   :  { %730 = vmax.xlane.f32.xlu0 %v729_v50  ;;  %v1286_v50 = vld [vmem:[%s1699_s6 + $0x30] sm:$0xff]  }
 0x9c1   :  { %749 = vrot.lane.b32.xlu1 %v1509_v27, %s1419_s26  ;;  %v498_v27 = vadd.f32 %v1573_v56, %v1583_v61  ;;  %v163_v56 = vld [vmem:[#allocation5 + $0xc] sm:$0xf] }
 0x9c2   :  { %v801_v61 = vsel %vm412_vm4, %v163_v56, 0 }
 0x9c3   :  { %1237 = vmatpush3.bf16.msra.mxu0 %v801_v61 }
 0x9c4   :  { %1242 = vmatprep.subr.bf16.mxu0 %v1411_v8 }
 0xa39   :  { %v728_v51 = vpop.xlane.xlu1 %727 }
 0xa3a   :  { %v732_v52 = vsub.f32 %v720_v44, %v728_v51  ;;  %v1287_v51 = vld [vmem:[%s1699_s6 + $0x28] sm:$0xff]  }
 0xa3c   :  { %v734_v53 = vmul.f32 1.442695, %v732_v52  ;;  %v1288_v52 = vld [vmem:[%s1699_s6 + $0x20] sm:$0xff]  }
 0xa3d   :  { %v750_v54 = vpop.permute.xlu1 %749  ;;  %v731_v55 = vpop.xlane.xlu0 %730 }
 0xa3e   :  { %1321 = vpow2.f32 %v734_v53  ;;  %v733_v39 = vsub.f32 %v723_v48, %v731_v55  ;;  %1231 = vmatpush3.bf16.msra.mxu1 %v750_v54  ;;  %v1289_v53 = vld [vmem:[%s1699_s6 + $0x18] sm:$0xff]   ;;  %v1290_v54 = vld [vmem:[%s1699_s6 + $0x10] sm:$0xff]   ;;  %v1291_v55 = vld [vmem:[%s1699_s6 + $0x8] sm:$0xff]  }
 0xa3f   :  { %904 = vmatprep.subr.bf16.mxu1 %v1281_v31 }
 0xa40   :  { %v736_v57 = vmul.f32 1.442695, %v733_v39  ;;  %v1292_v39 = vld [vmem:[%s1699_s6] sm:$0xff]   ;;  %s1421_s6 = smov [#allocation7]  }
 0xa41   :  { %s1075_s24 = sshll.u32 %s1421_s6, 4  ;;  %s1076_s24 = int_to_ptr.vmem [resolvable:$true] %s1075_s24 }
 0xa42   :  { %1323 = vpow2.f32 %v736_v57  ;;  %s1381_s25 = scalar_lea.vmem %s1076_s24, 128  ;;  %p1386_p11 = scmp.lt.s32.totalorder %s1076_s24, %s1076_s24 }
 0xa43   :  { %p1382_p10 = scmp.ne.s32.totalorder %s1076_s24, %s1381_s25  ;;  %p1387_p12 = scmp.lt.s32.totalorder %s1381_s25, %s1381_s25 }
 0xa45   :  { %p1388_p13 = por %p1387_p12, %p1386_p11 }
 0xa47   :  { %p1389_p0 = pnand %p1388_p13, %p1382_p10 }
 0xa4b   :  { %v1322_v59 = vpop.eup %1321 }
 0xa4c   :  { %v738_v43 = vsel %vm212_vm3, %v1322_v59, 0.0 }
 0xa4d   :  { %739 = vadd.xlane.f32.xlu0 %v738_v43 }
 0xa4f   :  { %v1324_v60 = vpop.eup %1323 }
 0xa50   :  { %v741_v62 = vsel %vm212_vm3, %v1324_v60, 0.0 }
 0xa51   :  { %742 = vadd.xlane.f32.xlu0 %v741_v62 }
 0xa6b   :  { %v666_v0 = vpop.f32.mrf.mxu1 }
 0xa6c   :  { %v673_v3 = vadd.f32 %v666_v0, %v498_v27 }
 0xa6d   :  { %v1222_v4 = vpop.f32.mrf.mxu1 }
 0xa6f   :  { %v669_v6 = vpop.f32.mrf.mxu1 }
 0xa70   :  { %v674_v7 = vadd.f32 %v669_v6, %v501_v5 }
 0xa71   :  { %v1223_v9 = vpop.f32.mrf.mxu1 }
 0xad6   :  { %v740_v10 = vpop.xlane.xlu0 %739 }
 0xad7   :  { %1325 = vrcp.f32 %v740_v10 }
 0xada   :  { %v743_v11 = vpop.xlane.xlu0 %742 }
 0xadb   :  { %1327 = vrcp.f32 %v743_v11 }
 0xae4   :  { %v1326_v12 = vpop.eup %1325 }
 0xae5   :  { %v746_v14 = vmul.f32 %v1326_v12, %v1322_v59 }
 0xae8   :  { %v1328_v13 = vpop.eup %1327 }
 0xae9   :  { %v747_v15 = vmul.f32 %v1328_v13, %v1324_v60 }
 0xaeb   :  { %v748_v16 = vpack.c.bf16 %v747_v15, %v746_v14 }
 0xaed   :  { %1233 = vmatmul.mubr.msk.bf16.vlgmr.msra.gmra.mxu1 %vm212_vm3, %v748_v16 }
 0xaee   :  { %924 = vmatprep.mubr.bf16.mxu1 %v1420_v33 }
 0xbad   :  { %v789_v58 = vpop.f32.mrf.mxu1 }
 0xbaf   :  { %v1234_v63 = vpop.f32.mrf.mxu1 }
 0xbb1   :  { %v792_v17 = vpop.f32.mrf.mxu1 }
 0xbb2   :  { %v796_v18 = vpack.c.bf16 %v792_v17, %v789_v58 }
 0xbb3   :  { %v1235_v19 = vpop.f32.mrf.mxu1 }
 0xbb4   :  { %1239 = vmatmul.mubr.msk.bf16.vlgmr.msra.gmra.mxu0 %vm164_vm2, %v796_v18 }
 0xbb5   :  { %1258 = vmatprep.mubr.msk.bf16.mxu0 %vm1412_vm1, %v1411_v8  ;;  %1243 = vmatpush3.bf16.msra.mxu0 %v1285_v49 }
 0xbb6   :  { %1244 = vmatprep.subr.bf16.mxu0 %v1411_v8 }
 0xbb9   :  { %1245 = vmatpush3.bf16.msra.mxu0 %v1286_v50 }
 0xbba   :  { %1246 = vmatprep.subr.bf16.mxu0 %v1411_v8 }
 0xbbd   :  { %1247 = vmatpush3.bf16.msra.mxu0 %v1287_v51 }
 0xbbe   :  { %1248 = vmatprep.subr.bf16.mxu0 %v1411_v8 }
 0xbc1   :  { %1249 = vmatpush3.bf16.msra.mxu0 %v1288_v52 }
 0xbc2   :  { %1250 = vmatprep.subr.bf16.mxu0 %v1411_v8 }
 0xbc5   :  { %1251 = vmatpush3.bf16.msra.mxu0 %v1289_v53 }
 0xbc6   :  { %1252 = vmatprep.subr.bf16.mxu0 %v1411_v8 }
 0xbc9   :  { %1253 = vmatpush3.bf16.msra.mxu0 %v1290_v54 }
 0xbca   :  { %1254 = vmatprep.subr.bf16.mxu0 %v1411_v8 }
 0xbcd   :  { %1255 = vmatpush3.bf16.msra.mxu0 %v1291_v55 }
 0xbce   :  { %1256 = vmatprep.subr.bf16.mxu0 %v1411_v8 }
 0xbd1   :  { %1257 = vmatpush3.bf16.msra.mxu0 %v1292_v39 }
 0xc74   :  { %v837_v20 = vpop.f32.mrf.mxu0 }
 0xc75   :  { %v844_v21 = vadd.f32 %v837_v20, %v673_v3 }
 0xc76   :  { %v1240_v32 = vpop.f32.mrf.mxu0 }
 0xc77   :  { %v1628_v37 = vadd.f32 %v1474_v1, %v844_v21  ;;  %v1279_v1 = vld [vmem:[%s1698_s5 + $0x10] ss:$8 sps:$4 sm:$0xff]  }
 0xc78   :  { %v840_v22 = vpop.f32.mrf.mxu0  ;;  %905 = vmatpush1.bf16.msra.mxu1 %v1279_v1 }
 0xc79   :  { %v845_v23 = vadd.f32 %v840_v22, %v674_v7  ;;  %v848_v24 = vmul.f32 %v1628_v37, %v1628_v37 }
 0xc7a   :  { %v1241_v25 = vpop.f32.mrf.mxu0 }
 0xc7b   :  { %v1633_v26 = vadd.f32 %v1476_v2, %v845_v23  ;;  %v850_v28 = vsel %vm62_vm0, %v848_v24, 0.0  ;;  %v1284_v2 = vld [vmem:[%s1698_s5 + $0x4] ss:$8 sps:$4 sm:$0xff]  }
 0xc7c   :  { %851 = vadd.xlane.f32.xlu0 %v850_v28  ;;  %906 = vmatprep.subr.bf16.mxu1 %v1284_v2 }
 0xc7d   :  { %v849_v29 = vmul.f32 %v1633_v26, %v1633_v26  ;;  %907 = vmatpush1.bf16.msra.mxu1 %v1282_v34 }
 0xc7f   :  { %v853_v30 = vsel %vm62_vm0, %v849_v29, 0.0 }
 0xc80   :  { %854 = vadd.xlane.f32.xlu0 %v853_v30 }
 0xd05   :  { %v852_v35 = vpop.xlane.xlu0 %851 }
 0xd06   :  { %v856_v36 = vmul.f32 0.03125, %v852_v35 }
 0xd08   :  { %v858_v38 = vadd.f32 1e-06, %v856_v36 }
 0xd09   :  { %v855_v40 = vpop.xlane.xlu0 %854 }
 0xd0a   :  { %v857_v41 = vmul.f32 0.03125, %v855_v40  ;;  %1329 = vrsqrt.f32 %v858_v38 }
 0xd0c   :  { %v859_v42 = vadd.f32 1e-06, %v857_v41 }
 0xd0e   :  { %1331 = vrsqrt.f32 %v859_v42 }
 0xd17   :  { %v1330_v44 = vpop.eup %1329 }
 0xd18   :  { %v862_v46 = vmul.f32 %v1330_v44, %v1628_v37 }
 0xd1b   :  { %v1332_v45 = vpop.eup %1331 }
 0xd1c   :  { %v863_v47 = vmul.f32 %v1332_v45, %v1633_v26 }
 0xd1e   :  { %v864_v48 = vpack.c.bf16 %v863_v47, %v862_v46 }
 0xd20   :  { %1107 = vmatmul.mubr.msk.bf16.vlgmr.msra.gmra.mxu1 %vm62_vm0, %v864_v48 }
 0xde0   :  { %v926_v57 = vpop.f32.mrf.mxu1 }
 0xde2   :  { %v928_v59 = vpop.f32.mrf.mxu1 }
 0xde3   :  { %v1108_v43 = vmul.f32 -1.442695, %v928_v59 }
 0xde4   :  { %v930_v60 = vpop.f32.mrf.mxu1 }
 0xde5   :  { %1333 = vpow2.f32 %v1108_v43 }
 0xde6   :  { %v932_v62 = vpop.f32.mrf.mxu1 }
 0xde7   :  { %v1109_v27 = vmul.f32 -1.442695, %v932_v62 }
 0xde9   :  { %1335 = vpow2.f32 %v1109_v27 }
 0xdf2   :  { %v1334_v0 = vpop.eup %1333 }
 0xdf3   :  { %v941_v3 = vadd.f32 1.0, %v1334_v0 }
 0xdf5   :  { %1337 = vrcp.f32 %v941_v3 }
 0xdf6   :  { %v1336_v4 = vpop.eup %1335 }
 0xdf7   :  { %v942_v5 = vadd.f32 1.0, %v1336_v4 }
 0xdf9   :  { %1339 = vrcp.f32 %v942_v5 }
 0xe02   :  { %v1338_v8 = vpop.eup %1337 }
 0xe03   :  { %v947_v6 = vmul.f32 %v1338_v8, %v928_v59 }
 0xe05   :  { %v949_v10 = vmul.f32 %v947_v6, %v926_v57 }
 0xe06   :  { %v1340_v7 = vpop.eup %1339 }
 0xe07   :  { %v948_v9 = vmul.f32 %v1340_v7, %v932_v62 }
 0xe09   :  { %v950_v11 = vmul.f32 %v948_v9, %v930_v60 }
 0xe0b   :  { %v951_v12 = vpack.c.bf16 %v950_v11, %v949_v10 }
 0xe0d   :  { %1259 = vmatmul.mubr.bf16.vlgmr.msra.gmra.mxu0 %v951_v12 }
 0xecd   :  { %v1050_v13 = vpop.f32.mrf.mxu0 }
 0xece   :  { %v1057_v14 = vadd.f32 %v1050_v13, %v1628_v37 }
 0xecf   :  { %v1260_v15 = vpop.f32.mrf.mxu0 }
 0xed0   :  { %v1120_v16 = vpack.c.bf16 %v1057_v14, %v1057_v14 }
 0xed1   :  { %v1053_v56 = vpop.f32.mrf.mxu0 }
 0xed2   :  { %v1058_v61 = vadd.f32 %v1053_v56, %v1633_v26  ;;  %1068 = vst.msk [vmem:[#allocation7] sm:$0xf] %vm1067_vm5, %v1120_v16 }
 0xed3   :  { %v1261_v58 = vpop.f32.mrf.mxu0 }
 0xed4   :  { %v1121_v63 = vpack.c.bf16 %v1058_v61, %v1058_v61 }
 0xed6   :  { %1069 = vst.msk [vmem:[#allocation7 + $0x4] sm:$0xf] %vm1067_vm5, %v1121_v63 }
 0xed7   :  { %1392 = shalt.err (!%p1389_p0)
}
 0xed8   :  { %1081 = dma.vmem_to_hbm [thread:$0]  %s1076_s24, 128, %s1700_s7, [#allocation4], %s1408_s27, %s1408_s27, %s1409_s28  }
 0xed9   :  { %1405 = dma.done.wait [#allocation4], 128  }
 0xeda   :  { %1406 = vsyncadd [#allocation4], 4294967168 }
 0xedb   :  { %1085 = vsyncpa [#allocation3], 1 }
 0xedc   :  { %1086 = vsyncpa [#allocation6], 1 }
 0xedd   :  { %1087 = vsyncpa [#allocation4], 1 }

</bundles_post_ra>
